<compile_context>
chip_gen: v7x
topology: tpu7x:2x2x1
jax: 0.10.0
libtpu: 0.0.40
codegen_flags: <defaults>
</compile_context>

<pallas_src>
import functools

import jax
import jax.numpy as jnp
from jax.experimental import pallas as pl
from jax.experimental.pallas import tpu as pltpu

LANE = 128  # lane-dense padded classifier-output width


def subgcn_tile_kernel(s_ref, x_ref, mask_ref, wg_ref, bg_ref,
                       w1_ref, b1_ref, w2_ref, b2_ref, out_ref,
                       *, fold_linear_first):
    """One grid step == one tile of G graphs.

    s_ref    [G, n, n]   bf16  per-graph normalized-adjacency blocks
    x_ref    [G, n, c]   bf16  per-graph node features
    mask_ref [G, n, 1]   f32   1.0 for valid nodes, 0.0 for padding
    out_ref  [G, LANE]   f32   row g holds graph g's logits in cols [:nc]
    """
    s = s_ref[...]
    h = x_ref[...]

    if fold_linear_first:
        # c_in > hidden: shrink the feature width before propagating
        # (associativity: S^3 (X W) == (S^3 X) W).  wg arrives in bf16 here.
        h = jnp.einsum('gnc,ch->gnh', h, wg_ref[...],
                       preferred_element_type=jnp.float32).astype(jnp.bfloat16)

    # SGConv K=3 propagation, batched over the graphs in the tile
    # (bf16 MXU inputs, f32 accumulation).
    h = jnp.einsum('gij,gjc->gic', s, h,
                   preferred_element_type=jnp.float32).astype(jnp.bfloat16)
    h = jnp.einsum('gij,gjc->gic', s, h,
                   preferred_element_type=jnp.float32).astype(jnp.bfloat16)
    h = jnp.einsum('gij,gjc->gic', s, h, preferred_element_type=jnp.float32)

    if not fold_linear_first:
        h = jnp.einsum('gnc,ch->gnh', h, wg_ref[...],
                       preferred_element_type=jnp.float32)
    h = h + jnp.expand_dims(bg_ref[...], 0)          # [1,1,hidden] broadcast
    h = jnp.maximum(h, 0.0)                          # ReLU

    # global_mean_pool per graph over its valid nodes (mask handles node padding;
    # fully padded graphs get a clamped count of 1 and a zero mean).
    m = mask_ref[...]                                # [G, n, 1] f32
    cnt = jnp.maximum(jnp.sum(m, axis=1), 1.0)       # [G, 1]
    h_avg = jnp.sum(h * m, axis=1) / cnt             # [G, hidden]

    # classifier: Dropout (eval identity) -> Linear -> ReLU -> Linear, whole tile at once.
    z = jnp.dot(h_avg, w1_ref[...], preferred_element_type=jnp.float32) + b1_ref[...]
    z = jnp.maximum(z, 0.0)
    out_ref[...] = jnp.dot(z, w2_ref[...], preferred_element_type=jnp.float32) + b2_ref[...]


def subgcn_forward(s_blocks, x_blocks, node_mask, wg, bg, w1, b1, w2, b2):
    """s_blocks [B, n, n], x_blocks [B, n, c_in], node_mask [B, n, 1]; weights [in, out]."""
    B, n_max, _ = s_blocks.shape
    c_in = x_blocks.shape[2]
    hidden = wg.shape[1]
    h2 = w1.shape[1]
    nc = w2.shape[1]

    # Lane-dense classifier output: pad the final layer to a 128-wide slab.
    w2p = jnp.zeros((h2, LANE), jnp.float32).at[:, :nc].set(w2)
    b2p = jnp.zeros((1, LANE), jnp.float32).at[:, :nc].set(b2)

    # bf16 storage for the propagation operands (halves HBM/VMEM bytes, bf16 MXU path).
    s_bf = s_blocks.astype(jnp.bfloat16)
    x_bf = x_blocks.astype(jnp.bfloat16)

    fold_linear_first = c_in > hidden
    wg_io = wg.astype(jnp.bfloat16) if fold_linear_first else wg

    # Graphs per grid step: multiple of 8 (sublane-aligned output rows), capped so the
    # double-buffered input tile stays a few MiB, and capped by the padded batch.
    per_graph_bytes = n_max * n_max * 2 + n_max * c_in * 2 + n_max * 4 + LANE * 4
    gb = max(1, (4 * 1024 * 1024) // per_graph_bytes)
    gb = max(8, min(64, (gb // 8) * 8))
    gb = min(gb, ((B + 7) // 8) * 8)
    num_tiles = pl.cdiv(B, gb)
    b_pad = num_tiles * gb

    def pad_b(a):
        pad = b_pad - a.shape[0]
        if pad == 0:
            return a
        return jnp.pad(a, ((0, pad),) + ((0, 0),) * (a.ndim - 1))

    s_bf = pad_b(s_bf)
    x_bf = pad_b(x_bf)
    mask_p = pad_b(node_mask)

    kernel = functools.partial(subgcn_tile_kernel,
                               fold_linear_first=fold_linear_first)

    prop_width = hidden if fold_linear_first else c_in
    flops = b_pad * (3 * 2 * n_max * n_max * prop_width          # S^3 propagation
                     + 2 * n_max * c_in * hidden                 # GCN linear
                     + 2 * hidden * h2 + 2 * h2 * LANE)          # classifier
    bytes_accessed = (s_bf.size * 2 + x_bf.size * 2 + mask_p.size * 4
                      + wg_io.size * wg_io.dtype.itemsize
                      + (bg.size + w1.size + b1.size) * 4
                      + (w2p.size + b2p.size) * 4 + b_pad * LANE * 4)

    tile_bytes = gb * per_graph_bytes
    param_bytes = 4 * (wg.size + bg.size + w1.size + b1.size + w2p.size + b2p.size)
    vmem_limit = int(min(100 * 2**20, max(32 * 2**20, 4 * tile_bytes + 2 * param_bytes)))

    grid_spec = pltpu.PrefetchScalarGridSpec(
        num_scalar_prefetch=0,
        grid=(num_tiles,),
        in_specs=[
            pl.BlockSpec((gb, n_max, n_max), lambda g: (g, 0, 0)),   # S blocks of tile g
            pl.BlockSpec((gb, n_max, c_in), lambda g: (g, 0, 0)),    # X blocks of tile g
            pl.BlockSpec((gb, n_max, 1), lambda g: (g, 0, 0)),       # node-valid mask
            pl.BlockSpec(wg_io.shape, lambda g: (0, 0)),             # params: constant block
            pl.BlockSpec(bg.shape, lambda g: (0, 0)),                # index -> fetched once
            pl.BlockSpec(w1.shape, lambda g: (0, 0)),
            pl.BlockSpec(b1.shape, lambda g: (0, 0)),
            pl.BlockSpec(w2p.shape, lambda g: (0, 0)),
            pl.BlockSpec(b2p.shape, lambda g: (0, 0)),
        ],
        out_specs=pl.BlockSpec((gb, LANE), lambda g: (g, 0)),
    )

    out_padded = pl.pallas_call(
        kernel,
        out_shape=jax.ShapeDtypeStruct((b_pad, LANE), jnp.float32),
        grid_spec=grid_spec,
        compiler_params=pltpu.CompilerParams(
            dimension_semantics=("parallel",),        # v7x: split graph tiles across 2 TCs
            vmem_limit_bytes=vmem_limit,
        ),
        cost_estimate=pl.CostEstimate(flops=int(flops), transcendentals=0,
                                      bytes_accessed=int(bytes_accessed)),
    )(s_bf, x_bf, mask_p, wg_io, bg, w1, b1, w2p, b2p)

    return out_padded[:B, :nc]


def build_norm_adj(edge_index, num_nodes):
    """S = D^-1/2 (A + I) D^-1/2, matching PyG gcn_norm with add_self_loops=True."""
    src, dst = edge_index[0], edge_index[1]
    adj = jnp.zeros((num_nodes, num_nodes), jnp.float32)
    adj = adj.at[dst, src].add(1.0)                 # message flows src -> dst
    adj = adj + jnp.eye(num_nodes, dtype=jnp.float32)
    deg = adj.sum(axis=1)
    d_inv_sqrt = jnp.where(deg > 0, 1.0 / jnp.sqrt(deg), 0.0)
    return d_inv_sqrt[:, None] * adj * d_inv_sqrt[None, :]


def build_mean_pool(batch, num_graphs):
    """P[b, i] = 1/count_b if batch[i] == b (pure-JAX reference only)."""
    onehot = (batch[None, :] == jnp.arange(num_graphs)[:, None]).astype(jnp.float32)
    counts = onehot.sum(axis=1, keepdims=True)
    return onehot / jnp.maximum(counts, 1.0)


if __name__ == "__main__":
    # Small shapes: 2 graphs of 8 nodes each, c_in=8, hidden=32, nc=4.
    NODES_PER_GRAPH, C_IN, HIDDEN, NC, B = 8, 8, 32, 4, 2
    N = B * NODES_PER_GRAPH

    key = jax.random.PRNGKey(0)
    kx, kwg, kbg, kw1, kb1, kw2, kb2 = jax.random.split(key, 7)

    # Node features and graph structure (deterministic bidirectional ring per graph).
    x = jax.random.normal(kx, (N, C_IN), jnp.float32)
    edges = []
    for g in range(B):
        base = g * NODES_PER_GRAPH
        for i in range(NODES_PER_GRAPH):
            a, b = base + i, base + (i + 1) % NODES_PER_GRAPH
            edges.append((a, b))
            edges.append((b, a))
    edge_index = jnp.array(edges, dtype=jnp.int32).T                   # [2, E]
    batch = jnp.repeat(jnp.arange(B, dtype=jnp.int32), NODES_PER_GRAPH)

    # Dense batched S / P only for the pure-JAX reference.
    s_dense = build_norm_adj(edge_index, N)                             # [N, N]
    p_dense = build_mean_pool(batch, B)                                 # [B, N]

    # Per-graph block-diagonal layout consumed by the kernel (nodes are contiguous
    # per graph and there are no cross-graph edges, so the diagonal blocks are exact).
    s_blocks = jnp.stack([s_dense[g * NODES_PER_GRAPH:(g + 1) * NODES_PER_GRAPH,
                                  g * NODES_PER_GRAPH:(g + 1) * NODES_PER_GRAPH]
                          for g in range(B)])                           # [B, n, n]
    x_blocks = x.reshape(B, NODES_PER_GRAPH, C_IN)                      # [B, n, c_in]
    node_mask = jnp.ones((B, NODES_PER_GRAPH, 1), jnp.float32)          # all nodes valid

    # Parameters (deterministic synthetic init; weights stored [in, out]).
    wg = 0.1 * jax.random.normal(kwg, (C_IN, HIDDEN), jnp.float32)
    bg = 0.1 * jax.random.normal(kbg, (1, HIDDEN), jnp.float32)
    w1 = 0.1 * jax.random.normal(kw1, (HIDDEN, HIDDEN // 2), jnp.float32)
    b1 = 0.1 * jax.random.normal(kb1, (1, HIDDEN // 2), jnp.float32)
    w2 = 0.1 * jax.random.normal(kw2, (HIDDEN // 2, NC), jnp.float32)
    b2 = 0.1 * jax.random.normal(kb2, (1, NC), jnp.float32)

    logits = subgcn_forward(s_blocks, x_blocks, node_mask, wg, bg, w1, b1, w2, b2)
    logits = jax.block_until_ready(logits)

    # Pure-JAX f32 reference (dense batched form, identical semantics).
    h_ref = s_dense @ (s_dense @ (s_dense @ x))
    h_ref = jnp.maximum(h_ref @ wg + bg, 0.0)
    h_avg_ref = p_dense @ h_ref
    z_ref = jnp.maximum(h_avg_ref @ w1 + b1, 0.0)
    logits_ref = z_ref @ w2 + b2

    assert logits.shape == (B, NC)
    # bf16 propagation vs f32 reference -> loosened tolerance.
    assert jnp.allclose(logits, logits_ref, atol=2e-2, rtol=2e-2)

    print("KERNEL_OK")
</pallas_src>

<mosaic_0001>
module attributes {stable_mosaic.version = 11 : i64} {
  func.func @subgcn_tile_kernel(%arg0: i32, %arg1: memref<8x8x8xbf16, #tpu.memory_space<vmem>>, %arg2: memref<8x8x8xbf16, #tpu.memory_space<vmem>>, %arg3: memref<8x8x1xf32, #tpu.memory_space<vmem>>, %arg4: memref<8x32xf32, #tpu.memory_space<vmem>>, %arg5: memref<1x32xf32, #tpu.memory_space<vmem>>, %arg6: memref<32x16xf32, #tpu.memory_space<vmem>>, %arg7: memref<1x16xf32, #tpu.memory_space<vmem>>, %arg8: memref<16x128xf32, #tpu.memory_space<vmem>>, %arg9: memref<1x128xf32, #tpu.memory_space<vmem>>, %arg10: memref<8x128xf32, #tpu.memory_space<vmem>>) attributes {dimension_semantics = [#tpu.dimension_semantics<parallel>], iteration_bounds = array<i64: 1>, scalar_prefetch = 0 : i64, scratch_operands = 0 : i64, tpu.core_type = #tpu.core_type<tc>, window_params = [{transform_indices = @transform_0, window_bounds = array<i64: 8, 8, 8>}, {transform_indices = @transform_1, window_bounds = array<i64: 8, 8, 8>}, {transform_indices = @transform_2, window_bounds = array<i64: 8, 8, 1>}, {pipeline_mode = #tpu.pipeline_mode<synchronous>, transform_indices = @transform_3, window_bounds = array<i64: 8, 32>}, {pipeline_mode = #tpu.pipeline_mode<synchronous>, transform_indices = @transform_4, window_bounds = array<i64: 1, 32>}, {pipeline_mode = #tpu.pipeline_mode<synchronous>, transform_indices = @transform_5, window_bounds = array<i64: 32, 16>}, {pipeline_mode = #tpu.pipeline_mode<synchronous>, transform_indices = @transform_6, window_bounds = array<i64: 1, 16>}, {pipeline_mode = #tpu.pipeline_mode<synchronous>, transform_indices = @transform_7, window_bounds = array<i64: 16, 128>}, {pipeline_mode = #tpu.pipeline_mode<synchronous>, transform_indices = @transform_8, window_bounds = array<i64: 1, 128>}, {transform_indices = @transform_9, window_bounds = array<i64: 8, 128>}]} {
    %c0 = arith.constant 0 : index
    %c0_0 = arith.constant 0 : index
    %c0_1 = arith.constant 0 : index
    %0 = vector.load %arg1[%c0, %c0_0, %c0_1] : memref<8x8x8xbf16, #tpu.memory_space<vmem>>, vector<8x8x8xbf16>
    %c0_2 = arith.constant 0 : index
    %c0_3 = arith.constant 0 : index
    %c0_4 = arith.constant 0 : index
    %1 = vector.load %arg2[%c0_2, %c0_3, %c0_4] : memref<8x8x8xbf16, #tpu.memory_space<vmem>>, vector<8x8x8xbf16>
    "tpu.trace_start"() <{level = 10 : i32, message = "gij,gjc->gic"}> : () -> ()
    %cst = arith.constant dense<0.000000e+00> : vector<8x8x8xf32>
    %2 = tpu.matmul %0, %1, %cst {dimension_numbers = #tpu.dot_dimension_numbers<[2], [1], [1], [2], [0, 0, 0, 1, 1, 2], [0], [0]>} : vector<8x8x8xbf16>, vector<8x8x8xbf16>, vector<8x8x8xf32> -> vector<8x8x8xf32>
    "tpu.trace_stop"() : () -> ()
    %3 = arith.truncf %2 : vector<8x8x8xf32> to vector<8x8x8xbf16>
    "tpu.trace_start"() <{level = 10 : i32, message = "gij,gjc->gic"}> : () -> ()
    %cst_5 = arith.constant dense<0.000000e+00> : vector<8x8x8xf32>
    %4 = tpu.matmul %0, %3, %cst_5 {dimension_numbers = #tpu.dot_dimension_numbers<[2], [1], [1], [2], [0, 0, 0, 1, 1, 2], [0], [0]>} : vector<8x8x8xbf16>, vector<8x8x8xbf16>, vector<8x8x8xf32> -> vector<8x8x8xf32>
    "tpu.trace_stop"() : () -> ()
    %5 = arith.truncf %4 : vector<8x8x8xf32> to vector<8x8x8xbf16>
    "tpu.trace_start"() <{level = 10 : i32, message = "gij,gjc->gic"}> : () -> ()
    %cst_6 = arith.constant dense<0.000000e+00> : vector<8x8x8xf32>
    %6 = tpu.matmul %0, %5, %cst_6 {dimension_numbers = #tpu.dot_dimension_numbers<[2], [1], [1], [2], [0, 0, 0, 1, 1, 2], [0], [0]>} : vector<8x8x8xbf16>, vector<8x8x8xbf16>, vector<8x8x8xf32> -> vector<8x8x8xf32>
    "tpu.trace_stop"() : () -> ()
    %c0_7 = arith.constant 0 : index
    %c0_8 = arith.constant 0 : index
    %7 = vector.load %arg4[%c0_7, %c0_8] : memref<8x32xf32, #tpu.memory_space<vmem>>, vector<8x32xf32>
    "tpu.trace_start"() <{level = 10 : i32, message = "gnc,ch->gnh"}> : () -> ()
    %cst_9 = arith.constant dense<0.000000e+00> : vector<8x8x32xf32>
    %8 = tpu.matmul %6, %7, %cst_9 {dimension_numbers = #tpu.dot_dimension_numbers<[2], [0], [0, 1], [1], [0, 0, 0, 1, 1, 1], [], []>} : vector<8x8x8xf32>, vector<8x32xf32>, vector<8x8x32xf32> -> vector<8x8x32xf32>
    "tpu.trace_stop"() : () -> ()
    %c0_10 = arith.constant 0 : index
    %c0_11 = arith.constant 0 : index
    %9 = vector.load %arg5[%c0_10, %c0_11] : memref<1x32xf32, #tpu.memory_space<vmem>>, vector<1x32xf32>
    %10 = vector.shape_cast %9 : vector<1x32xf32> to vector<1x1x32xf32>
    %11 = vector.broadcast %10 : vector<1x1x32xf32> to vector<8x8x32xf32>
    %12 = arith.addf %8, %11 : vector<8x8x32xf32>
    %cst_12 = arith.constant 0.000000e+00 : f32
    %13 = vector.broadcast %cst_12 : f32 to vector<8x8x32xf32>
    %14 = arith.maximumf %12, %13 : vector<8x8x32xf32>
    %c0_13 = arith.constant 0 : index
    %c0_14 = arith.constant 0 : index
    %c0_15 = arith.constant 0 : index
    %15 = vector.load %arg3[%c0_13, %c0_14, %c0_15] : memref<8x8x1xf32, #tpu.memory_space<vmem>>, vector<8x8x1xf32>
    %cst_16 = arith.constant dense<0.000000e+00> : vector<8x1xf32>
    %16 = vector.multi_reduction <add>, %15, %cst_16 [1] : vector<8x8x1xf32> to vector<8x1xf32>
    %cst_17 = arith.constant 1.000000e+00 : f32
    %17 = vector.broadcast %cst_17 : f32 to vector<8x1xf32>
    %18 = arith.maximumf %16, %17 : vector<8x1xf32>
    %19 = vector.broadcast %15 : vector<8x8x1xf32> to vector<8x8x32xf32>
    %20 = arith.mulf %14, %19 : vector<8x8x32xf32>
    %cst_18 = arith.constant dense<0.000000e+00> : vector<8x32xf32>
    %21 = vector.multi_reduction <add>, %20, %cst_18 [1] : vector<8x8x32xf32> to vector<8x32xf32>
    %22 = vector.broadcast %18 : vector<8x1xf32> to vector<8x32xf32>
    %23 = arith.divf %21, %22 : vector<8x32xf32>
    %c0_19 = arith.constant 0 : index
    %c0_20 = arith.constant 0 : index
    %24 = vector.load %arg6[%c0_19, %c0_20] : memref<32x16xf32, #tpu.memory_space<vmem>>, vector<32x16xf32>
    %cst_21 = arith.constant dense<0.000000e+00> : vector<8x16xf32>
    %25 = tpu.matmul %23, %24, %cst_21 {dimension_numbers = #tpu.dot_dimension_numbers<[1], [0], [0], [1], [0, 0, 1, 1], [], []>} : vector<8x32xf32>, vector<32x16xf32>, vector<8x16xf32> -> vector<8x16xf32>
    %c0_22 = arith.constant 0 : index
    %c0_23 = arith.constant 0 : index
    %26 = vector.load %arg7[%c0_22, %c0_23] : memref<1x16xf32, #tpu.memory_space<vmem>>, vector<1x16xf32>
    %27 = vector.broadcast %26 : vector<1x16xf32> to vector<8x16xf32>
    %28 = arith.addf %25, %27 : vector<8x16xf32>
    %cst_24 = arith.constant 0.000000e+00 : f32
    %29 = vector.broadcast %cst_24 : f32 to vector<8x16xf32>
    %30 = arith.maximumf %28, %29 : vector<8x16xf32>
    %c0_25 = arith.constant 0 : index
    %c0_26 = arith.constant 0 : index
    %31 = vector.load %arg8[%c0_25, %c0_26] : memref<16x128xf32, #tpu.memory_space<vmem>>, vector<16x128xf32>
    %cst_27 = arith.constant dense<0.000000e+00> : vector<8x128xf32>
    %32 = tpu.matmul %30, %31, %cst_27 {dimension_numbers = #tpu.dot_dimension_numbers<[1], [0], [0], [1], [0, 0, 1, 1], [], []>} : vector<8x16xf32>, vector<16x128xf32>, vector<8x128xf32> -> vector<8x128xf32>
    %c0_28 = arith.constant 0 : index
    %c0_29 = arith.constant 0 : index
    %33 = vector.load %arg9[%c0_28, %c0_29] : memref<1x128xf32, #tpu.memory_space<vmem>>, vector<1x128xf32>
    %34 = vector.broadcast %33 : vector<1x128xf32> to vector<8x128xf32>
    %35 = arith.addf %32, %34 : vector<8x128xf32>
    %c0_30 = arith.constant 0 : index
    %c0_31 = arith.constant 0 : index
    %36 = vector.load %arg10[%c0_30, %c0_31] : memref<8x128xf32, #tpu.memory_space<vmem>>, vector<8x128xf32>
    tpu.vector_store %arg10[%c0_30, %c0_31], %35 {strides = array<i32>} : memref<8x128xf32, #tpu.memory_space<vmem>>, vector<8x128xf32>,
    return
  }
  func.func @transform_0(%arg0: i32) -> (i32, i32, i32) {
    %c0_i32 = arith.constant 0 : i32
    %c0_i32_0 = arith.constant 0 : i32
    %c0_i32_1 = arith.constant 0 : i32
    return %arg0, %c0_i32, %c0_i32_0 : i32, i32, i32
  }
  func.func @transform_1(%arg0: i32) -> (i32, i32, i32) {
    %c0_i32 = arith.constant 0 : i32
    %c0_i32_0 = arith.constant 0 : i32
    %c0_i32_1 = arith.constant 0 : i32
    return %arg0, %c0_i32, %c0_i32_0 : i32, i32, i32
  }
  func.func @transform_2(%arg0: i32) -> (i32, i32, i32) {
    %c0_i32 = arith.constant 0 : i32
    %c0_i32_0 = arith.constant 0 : i32
    %c0_i32_1 = arith.constant 0 : i32
    return %arg0, %c0_i32, %c0_i32_0 : i32, i32, i32
  }
  func.func @transform_3(%arg0: i32) -> (i32, i32) {
    %c0_i32 = arith.constant 0 : i32
    %c0_i32_0 = arith.constant 0 : i32
    %c0_i32_1 = arith.constant 0 : i32
    return %c0_i32, %c0_i32_0 : i32, i32
  }
  func.func @transform_4(%arg0: i32) -> (i32, i32) {
    %c0_i32 = arith.constant 0 : i32
    %c0_i32_0 = arith.constant 0 : i32
    %c0_i32_1 = arith.constant 0 : i32
    return %c0_i32, %c0_i32_0 : i32, i32
  }
  func.func @transform_5(%arg0: i32) -> (i32, i32) {
    %c0_i32 = arith.constant 0 : i32
    %c0_i32_0 = arith.constant 0 : i32
    %c0_i32_1 = arith.constant 0 : i32
    return %c0_i32, %c0_i32_0 : i32, i32
  }
  func.func @transform_6(%arg0: i32) -> (i32, i32) {
    %c0_i32 = arith.constant 0 : i32
    %c0_i32_0 = arith.constant 0 : i32
    %c0_i32_1 = arith.constant 0 : i32
    return %c0_i32, %c0_i32_0 : i32, i32
  }
  func.func @transform_7(%arg0: i32) -> (i32, i32) {
    %c0_i32 = arith.constant 0 : i32
    %c0_i32_0 = arith.constant 0 : i32
    %c0_i32_1 = arith.constant 0 : i32
    return %c0_i32, %c0_i32_0 : i32, i32
  }
  func.func @transform_8(%arg0: i32) -> (i32, i32) {
    %c0_i32 = arith.constant 0 : i32
    %c0_i32_0 = arith.constant 0 : i32
    %c0_i32_1 = arith.constant 0 : i32
    return %c0_i32, %c0_i32_0 : i32, i32
  }
  func.func @transform_9(%arg0: i32) -> (i32, i32) {
    %c0_i32 = arith.constant 0 : i32
    %c0_i32_0 = arith.constant 0 : i32
    return %arg0, %c0_i32 : i32, i32
  }
}

</mosaic_0001>

<bundles_post_ra>
// kernel: tpu_custom_call.1
= control target key start
LH: loop header
LB: loop body
LE: loop exit
PB: predicated region body
PF: predicated region fallthrough
CT: control target
= control target key end

     0   :  { %vm54_vm0 = vcmask 1043456   ;;  %v2041_v2 = vmov 0.0   ;;  %vm50_vm1 = vcmask 64512   ;;  %vm2042_vm2 = vmmov 0   ;;  %s2415_s0 = inlined_call_operand.vmem [shape: bf16[8,8,8], index: 0, kind: input, shape index: {}]   ;;  %s2416_s1 = inlined_call_operand.vmem [shape: bf16[8,8,8], index: 1, kind: input, shape index: {}]   ;;  %s2417_s2 = inlined_call_operand.vmem [shape: f32[8,8,1], index: 2, kind: input, shape index: {}]   ;;  %s2418_s3 = inlined_call_operand.vmem [shape: f32[8,32], index: 3, kind: input, shape index: {}]   ;;  %s2419_s4 = inlined_call_operand.vmem [shape: f32[1,32], index: 4, kind: input, shape index: {}]   ;;  %s2420_s5 = inlined_call_operand.vmem [shape: f32[32,16], index: 5, kind: input, shape index: {}]   ;;  %s2421_s6 = inlined_call_operand.vmem [shape: f32[1,16], index: 6, kind: input, shape index: {}]   ;;  %s2422_s7 = inlined_call_operand.vmem [shape: f32[16,128], index: 7, kind: input, shape index: {}]   ;;  %s2423_s8 = inlined_call_operand.vmem [shape: f32[1,128], index: 8, kind: input, shape index: {}]   ;;  %s2424_s9 = inlined_call_operand.hbm [shape: f32[8,128], index: 9, kind: output, shape index: {}]  }
   0x1   :  { %v42_v0 = vld [vmem:[%s2416_s1] sm:$0xf]  ;;  %v43_v1 = vld [vmem:[%s2416_s1 + $0x4] sm:$0xf]  ;;  %1809 = vmatprep.subr.bf16.mxu0 %v2041_v2  ;;  %1815 = vmatprep.subr.bf16.mxu1 %v2041_v2  ;;  %v44_v7 = vld [vmem:[%s2416_s1 + $0x8] sm:$0xf] }
   0x2   :  { %v56_v3 = vsel %vm54_vm0, %v42_v0, 0  ;;  %v102_v4 = vsel %vm54_vm0, %v43_v1, 0  ;;  %v2109_v5 = vld [vmem:[%s2415_s0] sm:$0xf]  ;;  %v2114_v6 = vld [vmem:[%s2415_s0 + $0x4] sm:$0xf]  ;;  %1811 = vmatprep.mubr.msk.bf16.mxu0 %vm2042_vm2, %v2041_v2  ;;  %1817 = vmatprep.mubr.msk.bf16.mxu1 %vm2042_vm2, %v2041_v2 }
   0x3   :  { %1810 = vmatpush3.bf16.msra.mxu0 %v56_v3  ;;  %1816 = vmatpush3.bf16.msra.mxu1 %v102_v4  ;;  %v45_v8 = vld [vmem:[%s2416_s1 + $0xc] sm:$0xf]  ;;  %v148_v9 = vsel %vm54_vm0, %v44_v7, 0 }
   0x4   :  { %v194_v10 = vsel %vm54_vm0, %v45_v8, 0  ;;  %1821 = vmatprep.subr.bf16.mxu0 %v2041_v2  ;;  %1827 = vmatprep.subr.bf16.mxu1 %v2041_v2 }
   0x6   :  { %1812 = vmatmul.mubr.msk.bf16.vlgmr.msra.gmra.mrb[0].mxu0 %vm50_vm1, %v2109_v5  ;;  %1818 = vmatmul.mubr.msk.bf16.vlgmr.msra.gmra.mrb[0].mxu1 %vm50_vm1, %v2114_v6 }
   0x7   :  { %1822 = vmatpush3.bf16.msra.mxu0 %v148_v9  ;;  %1828 = vmatpush3.bf16.msra.mxu1 %v194_v10 }
   0x8   :  { %1823 = vmatprep.mubr.msk.bf16.mxu0 %vm2042_vm2, %v2041_v2  ;;  %1829 = vmatprep.mubr.msk.bf16.mxu1 %vm2042_vm2, %v2041_v2 }
   0x9   :  { %14 = vsyncpa [#allocation3], 0  ;;  %1833 = vmatprep.subr.bf16.mxu0 %v2041_v2  ;;  %1839 = vmatprep.subr.bf16.mxu1 %v2041_v2  ;;  %v46_v11 = vld [vmem:[%s2416_s1 + $0x10] sm:$0xf]  ;;  %v47_v12 = vld [vmem:[%s2416_s1 + $0x14] sm:$0xf] }
   0xa   :  { %v2149_v13 = vld [vmem:[%s2415_s0 + $0x8] sm:$0xf]  ;;  %v2154_v14 = vld [vmem:[%s2415_s0 + $0xc] sm:$0xf]  ;;  %v240_v15 = vsel %vm54_vm0, %v46_v11, 0  ;;  %v286_v16 = vsel %vm54_vm0, %v47_v12, 0 }
   0xb   :  { %v48_v17 = vld [vmem:[%s2416_s1 + $0x18] sm:$0xf]  ;;  %v49_v18 = vld [vmem:[%s2416_s1 + $0x1c] sm:$0xf]  ;;  %v2177_v19 = vld [vmem:[%s2415_s0 + $0x10] sm:$0xf] }
   0xc   :  { %v2182_v20 = vld [vmem:[%s2415_s0 + $0x14] sm:$0xf]  ;;  %v332_v21 = vsel %vm54_vm0, %v48_v17, 0  ;;  %v378_v22 = vsel %vm54_vm0, %v49_v18, 0  ;;  %v2199_v23 = vld [vmem:[%s2415_s0 + $0x18] sm:$0xf] }
   0xd   :  { %v2204_v24 = vld [vmem:[%s2415_s0 + $0x1c] sm:$0xf]  ;;  %vm1277_vm3 = vcmask 7168   ;;  %vm1390_vm4 = vcmask 261120   ;;  %vm1522_vm5 = vcmask 1041409   ;;  %vm1524_vm6 = vcmask 1042434  }
   0xe   :  { %1824 = vmatmul.mubr.msk.bf16.vlgmr.msra.gmra.mrb[4].mxu0 %vm50_vm1, %v2149_v13  ;;  %1830 = vmatmul.mubr.msk.bf16.vlgmr.msra.gmra.mrb[4].mxu1 %vm50_vm1, %v2154_v14  ;;  %vm1526_vm7 = vcmask 1043459   ;;  %vm1528_vm8 = vcmask 1044484   ;;  %vm1530_vm9 = vcmask 1045509   ;;  %vm1532_vm10 = vcmask 1046534   ;;  %s2045_s26 = smov [#allocation2]  }
   0xf   :  { %1834 = vmatpush3.bf16.msra.mxu0 %v240_v15  ;;  %1840 = vmatpush3.bf16.msra.mxu1 %v286_v16  ;;  %vm1534_vm11 = vcmask 1047559   ;;  %vm1618_vm12 = vcmask 130048   ;;  %s1699_s27 = sshll.u32 %s2045_s26, 4  ;;  %s1700_s27 = int_to_ptr.vmem [resolvable:$true] %s1699_s27 }
  0x10   :  { %1835 = vmatprep.mubr.msk.bf16.mxu0 %vm2042_vm2, %v2041_v2  ;;  %1841 = vmatprep.mubr.msk.bf16.mxu1 %vm2042_vm2, %v2041_v2  ;;  %p2022_p1 = scmp.lt.s32.totalorder %s1700_s27, %s1700_s27 }
  0x11   :  { %1845 = vmatprep.subr.bf16.mxu0 %v2041_v2  ;;  %1851 = vmatprep.subr.bf16.mxu1 %v2041_v2 }
  0x16   :  { %1836 = vmatmul.mubr.msk.bf16.vlgmr.msra.gmra.mrb[8].mxu0 %vm50_vm1, %v2177_v19  ;;  %1842 = vmatmul.mubr.msk.bf16.vlgmr.msra.gmra.mrb[8].mxu1 %vm50_vm1, %v2182_v20 }
  0x17   :  { %1846 = vmatpush3.bf16.msra.mxu0 %v332_v21  ;;  %1852 = vmatpush3.bf16.msra.mxu1 %v378_v22 }
  0x18   :  { %1847 = vmatprep.mubr.msk.bf16.mxu0 %vm2042_vm2, %v2041_v2  ;;  %1853 = vmatprep.mubr.msk.bf16.mxu1 %vm2042_vm2, %v2041_v2 }
  0x19   :  { %1857 = vmatprep.subr.bf16.mxu0 %v2041_v2  ;;  %1863 = vmatprep.subr.bf16.mxu1 %v2041_v2 }
  0x1e   :  { %1848 = vmatmul.mubr.msk.bf16.vlgmr.msra.gmra.mrb[12].mxu0 %vm50_vm1, %v2199_v23  ;;  %1854 = vmatmul.mubr.msk.bf16.vlgmr.msra.gmra.mrb[12].mxu1 %vm50_vm1, %v2204_v24 }
  0x1f   :  { %1859 = vmatprep.mubr.msk.bf16.mxu0 %vm2042_vm2, %v2041_v2  ;;  %1865 = vmatprep.mubr.msk.bf16.mxu1 %vm2042_vm2, %v2041_v2 }
  0xd9   :  { %v92_v25 = vpop.f32.mrb[0].mxu0  ;;  %v138_v26 = vpop.f32.mrb[0].mxu1 }
  0xda   :  { %v420_v27 = vpack.c.bf16 %v92_v25, %v92_v25  ;;  %v421_v28 = vpack.c.bf16 %v138_v26, %v138_v26  ;;  %v1813_v29 = vpop.f32.mrb[1].mxu0  ;;  %v1819_v30 = vpop.f32.mrb[1].mxu1 }
  0xdb   :  { %v95_v31 = vpop.f32.mrb[2].mxu0  ;;  %v141_v32 = vpop.f32.mrb[2].mxu1 }
  0xdc   :  { %v429_v33 = vsel %vm54_vm0, %v420_v27, 0  ;;  %v472_v34 = vsel %vm54_vm0, %v421_v28, 0  ;;  %v1814_v35 = vpop.f32.mrb[3].mxu0  ;;  %v1820_v36 = vpop.f32.mrb[3].mxu1 }
  0xdd   :  { %1858 = vmatpush3.bf16.msra.mxu0 %v429_v33  ;;  %1864 = vmatpush3.bf16.msra.mxu1 %v472_v34 }
  0xde   :  { %1869 = vmatprep.subr.bf16.mxu0 %v2041_v2  ;;  %1875 = vmatprep.subr.bf16.mxu1 %v2041_v2 }
  0xe0   :  { %1860 = vmatmul.mubr.msk.bf16.vlgmr.msra.gmra.mrb[16].mxu0 %vm50_vm1, %v2109_v5  ;;  %1866 = vmatmul.mubr.msk.bf16.vlgmr.msra.gmra.mrb[16].mxu1 %vm50_vm1, %v2114_v6 }
  0xe1   :  { %v184_v37 = vpop.f32.mrb[4].mxu0  ;;  %v230_v38 = vpop.f32.mrb[4].mxu1  ;;  %1871 = vmatprep.mubr.msk.bf16.mxu0 %vm2042_vm2, %v2041_v2  ;;  %1877 = vmatprep.mubr.msk.bf16.mxu1 %vm2042_vm2, %v2041_v2 }
  0xe2   :  { %v422_v39 = vpack.c.bf16 %v184_v37, %v184_v37  ;;  %v423_v40 = vpack.c.bf16 %v230_v38, %v230_v38  ;;  %v1825_v41 = vpop.f32.mrb[5].mxu0  ;;  %v1831_v42 = vpop.f32.mrb[5].mxu1 }
  0xe3   :  { %v187_v43 = vpop.f32.mrb[6].mxu0  ;;  %v233_v44 = vpop.f32.mrb[6].mxu1 }
  0xe4   :  { %v515_v45 = vsel %vm54_vm0, %v422_v39, 0  ;;  %v558_v46 = vsel %vm54_vm0, %v423_v40, 0  ;;  %v1826_v47 = vpop.f32.mrb[7].mxu0  ;;  %v1832_v48 = vpop.f32.mrb[7].mxu1 }
  0xe5   :  { %1870 = vmatpush3.bf16.msra.mxu0 %v515_v45  ;;  %1876 = vmatpush3.bf16.msra.mxu1 %v558_v46 }
  0xe6   :  { %1881 = vmatprep.subr.bf16.mxu0 %v2041_v2  ;;  %1887 = vmatprep.subr.bf16.mxu1 %v2041_v2 }
  0xe8   :  { %1872 = vmatmul.mubr.msk.bf16.vlgmr.msra.gmra.mrb[20].mxu0 %vm50_vm1, %v2149_v13  ;;  %1878 = vmatmul.mubr.msk.bf16.vlgmr.msra.gmra.mrb[20].mxu1 %vm50_vm1, %v2154_v14 }
  0xe9   :  { %v276_v49 = vpop.f32.mrb[8].mxu0  ;;  %v322_v50 = vpop.f32.mrb[8].mxu1  ;;  %1883 = vmatprep.mubr.msk.bf16.mxu0 %vm2042_vm2, %v2041_v2  ;;  %1889 = vmatprep.mubr.msk.bf16.mxu1 %vm2042_vm2, %v2041_v2 }
  0xea   :  { %v424_v51 = vpack.c.bf16 %v276_v49, %v276_v49  ;;  %v425_v52 = vpack.c.bf16 %v322_v50, %v322_v50  ;;  %v1837_v53 = vpop.f32.mrb[9].mxu0  ;;  %v1843_v54 = vpop.f32.mrb[9].mxu1 }
  0xeb   :  { %v279_v55 = vpop.f32.mrb[10].mxu0  ;;  %v325_v56 = vpop.f32.mrb[10].mxu1 }
  0xec   :  { %v601_v57 = vsel %vm54_vm0, %v424_v51, 0  ;;  %v644_v58 = vsel %vm54_vm0, %v425_v52, 0  ;;  %v1838_v59 = vpop.f32.mrb[11].mxu0  ;;  %v1844_v60 = vpop.f32.mrb[11].mxu1 }
  0xed   :  { %1882 = vmatpush3.bf16.msra.mxu0 %v601_v57  ;;  %1888 = vmatpush3.bf16.msra.mxu1 %v644_v58  ;;  %v1124_v60 = vld [vmem:[%s2418_s3] sm:$0xff] }
  0xee   :  { %1893 = vmatprep.subr.bf16.mxu0 %v2041_v2  ;;  %1899 = vmatprep.subr.bf16.mxu1 %v2041_v2 }
  0xf0   :  { %1884 = vmatmul.mubr.msk.bf16.vlgmr.msra.gmra.mrb[24].mxu0 %vm50_vm1, %v2177_v19  ;;  %1890 = vmatmul.mubr.msk.bf16.vlgmr.msra.gmra.mrb[24].mxu1 %vm50_vm1, %v2182_v20 }
  0xf1   :  { %v368_v61 = vpop.f32.mrb[12].mxu0  ;;  %v414_v62 = vpop.f32.mrb[12].mxu1  ;;  %1895 = vmatprep.mubr.msk.bf16.mxu0 %vm2042_vm2, %v2041_v2  ;;  %1901 = vmatprep.mubr.msk.bf16.mxu1 %vm2042_vm2, %v2041_v2 }
  0xf2   :  { %v426_v63 = vpack.c.bf16 %v368_v61, %v368_v61  ;;  %v427_v0 = vpack.c.bf16 %v414_v62, %v414_v62  ;;  %v1849_v1 = vpop.f32.mrb[13].mxu0  ;;  %v1855_v3 = vpop.f32.mrb[13].mxu1  ;;  %v1269_v61 = vld [vmem:[%s2417_s2] sm:$0xff]  ;;  %v2043_v62 = vmov 0  }
  0xf3   :  { %v371_v4 = vpop.f32.mrb[14].mxu0  ;;  %v417_v7 = vpop.f32.mrb[14].mxu1  ;;  %1999 = vset.pattern.permute.xlu0 %v2043_v62  ;;  %2000 = vset.pattern.permute.xlu1 %v2043_v62  ;;  %v1272_v3 = vld [vmem:[%s2417_s2 + $0x18] sm:$0xff] }
  0xf4   :  { %v687_v8 = vsel %vm54_vm0, %v426_v63, 0  ;;  %v730_v9 = vsel %vm54_vm0, %v427_v0, 0  ;;  %v1850_v10 = vpop.f32.mrb[15].mxu0  ;;  %v1856_v11 = vpop.f32.mrb[15].mxu1  ;;  %v1278_v63 = vsel %vm1277_vm3, %v1269_v61, 0.0  ;;  %v1273_v4 = vld [vmem:[%s2417_s2 + $0x20] sm:$0xff]  ;;  %1344 = vperm.xlu0 %1999, %v1269_v61  }
  0xf5   :  { %1894 = vmatpush3.bf16.msra.mxu0 %v687_v8  ;;  %1900 = vmatpush3.bf16.msra.mxu1 %v730_v9  ;;  %v1274_v7 = vld [vmem:[%s2417_s2 + $0x28] sm:$0xff]  ;;  %v1279_v8 = vrot.slane %v1278_v63, 4  ;;  %v1299_v11 = vsel %vm1277_vm3, %v1272_v3, 0.0 }
  0xf6   :  { %1905 = vmatprep.subr.bf16.mxu0 %v2041_v2  ;;  %1911 = vmatprep.subr.bf16.mxu1 %v2041_v2 }
  0xf8   :  { %1896 = vmatmul.mubr.msk.bf16.vlgmr.msra.gmra.mrb[28].mxu0 %vm50_vm1, %v2199_v23  ;;  %1902 = vmatmul.mubr.msk.bf16.vlgmr.msra.gmra.mrb[28].mxu1 %vm50_vm1, %v2204_v24 }
  0xf9   :  { %1907 = vmatprep.mubr.msk.bf16.mxu0 %vm2042_vm2, %v2041_v2  ;;  %1913 = vmatprep.mubr.msk.bf16.mxu1 %vm2042_vm2, %v2041_v2 }
 0x1b3   :  { %v465_v12 = vpop.f32.mrb[16].mxu0  ;;  %v508_v15 = vpop.f32.mrb[16].mxu1 }
 0x1b4   :  { %v772_v16 = vpack.c.bf16 %v465_v12, %v465_v12  ;;  %v773_v17 = vpack.c.bf16 %v508_v15, %v508_v15  ;;  %v1861_v18 = vpop.f32.mrb[17].mxu0  ;;  %v1867_v21 = vpop.f32.mrb[17].mxu1  ;;  %v1275_v12 = vld [vmem:[%s2417_s2 + $0x30] sm:$0xff]  ;;  %v1276_v15 = vld [vmem:[%s2417_s2 + $0x38] sm:$0xff] }
 0x1b5   :  { %v468_v22 = vpop.f32.mrb[18].mxu0  ;;  %v511_v25 = vpop.f32.mrb[18].mxu1  ;;  %v1313_v18 = vsel %vm1277_vm3, %v1274_v7, 0.0  ;;  %v1320_v21 = vsel %vm1277_vm3, %v1275_v12, 0.0 }
 0x1b6   :  { %v781_v26 = vsel %vm54_vm0, %v772_v16, 0  ;;  %v824_v27 = vsel %vm54_vm0, %v773_v17, 0  ;;  %v1862_v28 = vpop.f32.mrb[19].mxu0  ;;  %v1868_v29 = vpop.f32.mrb[19].mxu1  ;;  %v1300_v16 = vrot.slane %v1299_v11, 4  ;;  %v1306_v17 = vsel %vm1277_vm3, %v1273_v4, 0.0 }
 0x1b7   :  { %1906 = vmatpush3.bf16.msra.mxu0 %v781_v26  ;;  %1912 = vmatpush3.bf16.msra.mxu1 %v824_v27  ;;  %v1280_v22 = vadd.f32 %v1279_v8, %v1278_v63  ;;  %v1307_v27 = vrot.slane %v1306_v17, 4  ;;  %v1314_v29 = vrot.slane %v1313_v18, 4 }
 0x1b8   :  { %1917 = vmatprep.subr.bf16.mxu0 %v2041_v2  ;;  %1923 = vmatprep.subr.bf16.mxu1 %v2041_v2  ;;  %v1301_v28 = vadd.f32 %v1300_v16, %v1299_v11 }
 0x1ba   :  { %1908 = vmatmul.mubr.msk.bf16.vlgmr.msra.gmra.mrb[32].mxu0 %vm50_vm1, %v2109_v5  ;;  %1914 = vmatmul.mubr.msk.bf16.vlgmr.msra.gmra.mrb[32].mxu1 %vm50_vm1, %v2114_v6 }
 0x1bb   :  { %v551_v30 = vpop.f32.mrb[20].mxu0  ;;  %v594_v31 = vpop.f32.mrb[20].mxu1  ;;  %1919 = vmatprep.mubr.msk.bf16.mxu0 %vm2042_vm2, %v2041_v2  ;;  %1925 = vmatprep.mubr.msk.bf16.mxu1 %vm2042_vm2, %v2041_v2 }
 0x1bc   :  { %v774_v32 = vpack.c.bf16 %v551_v30, %v551_v30  ;;  %v775_v33 = vpack.c.bf16 %v594_v31, %v594_v31  ;;  %v1873_v34 = vpop.f32.mrb[21].mxu0  ;;  %v1879_v35 = vpop.f32.mrb[21].mxu1  ;;  %v1321_v30 = vrot.slane %v1320_v21, 4  ;;  %v1327_v31 = vsel %vm1277_vm3, %v1276_v15, 0.0 }
 0x1bd   :  { %v554_v36 = vpop.f32.mrb[22].mxu0  ;;  %v597_v37 = vpop.f32.mrb[22].mxu1  ;;  %v1308_v35 = vadd.f32 %v1307_v27, %v1306_v17 }
 0x1be   :  { %v867_v38 = vsel %vm54_vm0, %v774_v32, 0  ;;  %v910_v5 = vsel %vm54_vm0, %v775_v33, 0  ;;  %v1874_v39 = vpop.f32.mrb[23].mxu0  ;;  %v1880_v6 = vpop.f32.mrb[23].mxu1  ;;  %v1281_v32 = vrot.slane %v1280_v22, 2  ;;  %v1302_v36 = vrot.slane %v1301_v28, 2 }
 0x1bf   :  { %1918 = vmatpush3.bf16.msra.mxu0 %v867_v38  ;;  %1924 = vmatpush3.bf16.msra.mxu1 %v910_v5  ;;  %v1315_v37 = vadd.f32 %v1314_v29, %v1313_v18  ;;  %v1322_v38 = vadd.f32 %v1321_v30, %v1320_v21  ;;  %v1328_v5 = vrot.slane %v1327_v31, 4 }
 0x1c0   :  { %1929 = vmatprep.subr.bf16.mxu0 %v2041_v2  ;;  %1935 = vmatprep.subr.bf16.mxu1 %v2041_v2  ;;  %v1282_v39 = vadd.f32 %v1281_v32, %v1280_v22 }
 0x1c2   :  { %1920 = vmatmul.mubr.msk.bf16.vlgmr.msra.gmra.mrb[36].mxu0 %vm50_vm1, %v2149_v13  ;;  %1926 = vmatmul.mubr.msk.bf16.vlgmr.msra.gmra.mrb[36].mxu1 %vm50_vm1, %v2154_v14 }
 0x1c3   :  { %v637_v40 = vpop.f32.mrb[24].mxu0  ;;  %v680_v41 = vpop.f32.mrb[24].mxu1  ;;  %1931 = vmatprep.mubr.msk.bf16.mxu0 %vm2042_vm2, %v2041_v2  ;;  %1937 = vmatprep.mubr.msk.bf16.mxu1 %vm2042_vm2, %v2041_v2 }
 0x1c4   :  { %v776_v42 = vpack.c.bf16 %v637_v40, %v637_v40  ;;  %v777_v43 = vpack.c.bf16 %v680_v41, %v680_v41  ;;  %v1885_v44 = vpop.f32.mrb[25].mxu0  ;;  %v1891_v45 = vpop.f32.mrb[25].mxu1  ;;  %v1309_v41 = vrot.slane %v1308_v35, 2 }
 0x1c5   :  { %v640_v46 = vpop.f32.mrb[26].mxu0  ;;  %v683_v47 = vpop.f32.mrb[26].mxu1  ;;  %v1323_v44 = vrot.slane %v1322_v38, 2  ;;  %v1329_v45 = vadd.f32 %v1328_v5, %v1327_v31 }
 0x1c6   :  { %v953_v48 = vsel %vm54_vm0, %v776_v42, 0  ;;  %v996_v13 = vsel %vm54_vm0, %v777_v43, 0  ;;  %v1886_v49 = vpop.f32.mrb[27].mxu0  ;;  %v1892_v14 = vpop.f32.mrb[27].mxu1  ;;  %v1303_v42 = vadd.f32 %v1302_v36, %v1301_v28  ;;  %v1316_v43 = vrot.slane %v1315_v37, 2 }
 0x1c7   :  { %1930 = vmatpush3.bf16.msra.mxu0 %v953_v48  ;;  %1936 = vmatpush3.bf16.msra.mxu1 %v996_v13  ;;  %v1310_v46 = vadd.f32 %v1309_v41, %v1308_v35  ;;  %v1283_v48 = vrot.slane %v1282_v39, 1  ;;  %v1330_v14 = vrot.slane %v1329_v45, 2 }
 0x1c8   :  { %1941 = vmatprep.subr.bf16.mxu0 %v2041_v2  ;;  %1947 = vmatprep.subr.bf16.mxu1 %v2041_v2  ;;  %v1317_v49 = vadd.f32 %v1316_v43, %v1315_v37 }
 0x1ca   :  { %1932 = vmatmul.mubr.msk.bf16.vlgmr.msra.gmra.mrb[40].mxu0 %vm50_vm1, %v2177_v19  ;;  %1938 = vmatmul.mubr.msk.bf16.vlgmr.msra.gmra.mrb[40].mxu1 %vm50_vm1, %v2182_v20 }
 0x1cb   :  { %v723_v50 = vpop.f32.mrb[28].mxu0  ;;  %v766_v51 = vpop.f32.mrb[28].mxu1  ;;  %1943 = vmatprep.mubr.msk.bf16.mxu0 %vm2042_vm2, %v2041_v2  ;;  %1949 = vmatprep.mubr.msk.bf16.mxu1 %vm2042_vm2, %v2041_v2 }
 0x1cc   :  { %v778_v52 = vpack.c.bf16 %v723_v50, %v723_v50  ;;  %v779_v53 = vpack.c.bf16 %v766_v51, %v766_v51  ;;  %v1897_v54 = vpop.f32.mrb[29].mxu0  ;;  %v1903_v55 = vpop.f32.mrb[29].mxu1  ;;  %v1284_v51 = vadd.f32 %v1283_v48, %v1282_v39  ;;  %v1505_v48 = vld [vmem:[%s2420_s5 + $0x10] sm:$0xff] }
 0x1cd   :  { %v726_v56 = vpop.f32.mrb[30].mxu0  ;;  %v769_v57 = vpop.f32.mrb[30].mxu1  ;;  %v1324_v54 = vadd.f32 %v1323_v44, %v1322_v38  ;;  %v1503_v44 = vld [vmem:[%s2420_s5] sm:$0xff] }
 0x1ce   :  { %v1039_v58 = vsel %vm54_vm0, %v778_v52, 0  ;;  %v1082_v19 = vsel %vm54_vm0, %v779_v53, 0  ;;  %v1898_v59 = vpop.f32.mrb[31].mxu0  ;;  %v1904_v20 = vpop.f32.mrb[31].mxu1  ;;  %v1304_v53 = vrot.slane %v1303_v42, 1  ;;  %v1334_v56 = vmax.f32 %v1284_v51, 1.0 }
 0x1cf   :  { %1942 = vmatpush3.bf16.msra.mxu0 %v1039_v58  ;;  %1948 = vmatpush3.bf16.msra.mxu1 %v1082_v19  ;;  %v1311_v57 = vrot.slane %v1310_v46, 1  ;;  %v1331_v19 = vadd.f32 %v1330_v14, %v1329_v45  ;;  %v1318_v20 = vrot.slane %v1317_v49, 1  ;;  %v1325_v61 = vrot.slane %v1324_v54, 1  ;;  %v1504_v45 = vld [vmem:[%s2420_s5 + $0x8] sm:$0xff]  ;;  %v1345_v14 = vpop.permute.xlu0 %1344 }
 0x1d0   :  { %1953 = vmatprep.subr.mxu0 %v1124_v60  ;;  %v1305_v59 = vadd.f32 %v1304_v53, %v1303_v42 }
 0x1d1   :  { %v1332_v62 = vrot.slane %v1331_v19, 1 }
 0x1d2   :  { %1944 = vmatmul.mubr.msk.bf16.vlgmr.msra.gmra.mrb[44].mxu0 %vm50_vm1, %v2199_v23  ;;  %1950 = vmatmul.mubr.msk.bf16.vlgmr.msra.gmra.mrb[44].mxu1 %vm50_vm1, %v2204_v24  ;;  %v1271_v23 = vld [vmem:[%s2417_s2 + $0x10] sm:$0xff]  ;;  %v1270_v24 = vld [vmem:[%s2417_s2 + $0x8] sm:$0xff] }
 0x1d3   :  { %1975 = vmatprep.mubr.msk.f32.mxu1 %vm2042_vm2, %v2041_v2  ;;  %1954 = vmatpush3.msra.mxu0 %v1124_v60  ;;  %v1292_v0 = vsel %vm1277_vm3, %v1271_v23, 0.0  ;;  %v1285_v1 = vsel %vm1277_vm3, %v1270_v24, 0.0  ;;  %v1312_v60 = vadd.f32 %v1311_v57, %v1310_v46  ;;  %v1986_v46 = vpack.c.bf16 %v1504_v45, %v1503_v44 }
 0x1d4   :  { %1354 = vperm.xlu1 %2000, %v1271_v23   ;;  %v1293_v9 = vrot.slane %v1292_v0, 4  ;;  %v1286_v10 = vrot.slane %v1285_v1, 4  ;;  %1349 = vperm.xlu0 %1999, %v1270_v24   ;;  %v1337_v23 = vmax.f32 %v1305_v59, 1.0  ;;  %v1319_v24 = vadd.f32 %v1318_v20, %v1317_v49 }
 0x1d5   :  { %v1338_v63 = vmax.f32 %v1312_v60, 1.0 }
 0x1d6   :  { %v1294_v25 = vadd.f32 %v1293_v9, %v1292_v0  ;;  %v1287_v26 = vadd.f32 %v1286_v10, %v1285_v1  ;;  %v1326_v0 = vadd.f32 %v1325_v61, %v1324_v54  ;;  %v1339_v1 = vmax.f32 %v1319_v24, 1.0  ;;  %v2366_v54 = vld [vmem:[%s2419_s4] ss:$0 sm:$0xff] }
 0x1d8   :  { %v1295_v33 = vrot.slane %v1294_v25, 2  ;;  %v1288_v34 = vrot.slane %v1287_v26, 2  ;;  %1359 = vperm.xlu1 %2000, %v1272_v3   ;;  %1364 = vperm.xlu0 %1999, %v1273_v4   ;;  %v1333_v3 = vadd.f32 %v1332_v62, %v1331_v19  ;;  %v1340_v4 = vmax.f32 %v1326_v0, 1.0 }
 0x1da   :  { %v1296_v6 = vadd.f32 %v1295_v33, %v1294_v25  ;;  %v1289_v40 = vadd.f32 %v1288_v34, %v1287_v26 }
 0x1dc   :  { %1369 = vperm.xlu1 %2000, %v1274_v7   ;;  %v1290_v47 = vrot.slane %v1289_v40, 1  ;;  %v1297_v13 = vrot.slane %v1296_v6, 1  ;;  %1374 = vperm.xlu0 %1999, %v1275_v12   ;;  %v1341_v7 = vmax.f32 %v1333_v3, 1.0 }
 0x1de   :  { %v1291_v50 = vadd.f32 %v1290_v47, %v1289_v40  ;;  %v1298_v52 = vadd.f32 %v1297_v13, %v1296_v6  ;;  %v2044_v47 = vmov 0.0|0.0   ;;  %v1506_v13 = vld [vmem:[%s2420_s5 + $0x18] sm:$0xff] }
 0x1df   :  { %1985 = vmatprep.subr.bf16.mxu1 %v2044_v47  ;;  %v1989_v49 = vpack.c.bf16 %v1506_v13, %v1505_v48 }
 0x1e0   :  { %v1335_v55 = vmax.f32 %v1291_v50, 1.0  ;;  %v1336_v58 = vmax.f32 %v1298_v52, 1.0  ;;  %1449 = vperm.xlu0 %1999, %v1334_v56   ;;  %1987 = vmatpush3.bf16.msra.mxu1 %v1986_v46 }
 0x1e1   :  { %1988 = vmatprep.subr.bf16.mxu1 %v2044_v47 }
 0x1e2   :  { %1454 = vperm.xlu1 %2000, %v1335_v55  }
 0x1e4   :  { %1379 = vperm.xlu0 %1999, %v1276_v15   ;;  %1990 = vmatpush3.bf16.msra.mxu1 %v1989_v49 }
 0x1e5   :  { %1991 = vmatprep.subr.bf16.mxu1 %v2044_v47 }
 0x1e6   :  { %1459 = vperm.xlu1 %2000, %v1336_v58  }
 0x1e8   :  { %1469 = vperm.xlu0 %1999, %v1338_v63  }
 0x1ea   :  { %1464 = vperm.xlu1 %2000, %v1337_v23  }
 0x1ec   :  { %1479 = vperm.xlu0 %1999, %v1340_v4  }
 0x1ee   :  { %1474 = vperm.xlu1 %2000, %v1339_v1  }
 0x1f2   :  { %1484 = vperm.xlu1 %2000, %v1341_v7  }
 0x253   :  { %v1355_v50 = vpop.permute.xlu1 %1354  ;;  %v1350_v51 = vpop.permute.xlu0 %1349 }
 0x257   :  { %v1360_v52 = vpop.permute.xlu1 %1359  ;;  %v2361_v53 = vpop.permute.xlu0 %1364 }
 0x25b   :  { %v1370_v55 = vpop.permute.xlu1 %1369  ;;  %v2370_v59 = vpop.permute.xlu0 %1374 }
 0x25f   :  { %v1450_v3 = vpop.permute.xlu0 %1449 }
 0x261   :  { %v1455_v23 = vpop.permute.xlu1 %1454 }
 0x262   :  { %2001 = vrcp.f32 %v1455_v23 }
 0x263   :  { %2003 = vrcp.f32 %v1450_v3 }
 0x28d   :  { %v817_v8 = vpop.f32.mrb[32].mxu0  ;;  %v860_v9 = vpop.f32.mrb[32].mxu1 }
 0x28e   :  { %1955 = vmatprep.mubr.msk.f32.mxu0 %vm50_vm1, %v817_v8  ;;  %v1909_v10 = vpop.f32.mrb[33].mxu0  ;;  %v1915_v11 = vpop.f32.mrb[33].mxu1 }
 0x28f   :  { %1956 = vmatmul.mubr.msk.f32.vlgmr.msra.gmra.mrb[48].mxu0 %vm50_vm1, %v860_v9  ;;  %v820_v12 = vpop.f32.mrb[34].mxu0  ;;  %v863_v15 = vpop.f32.mrb[34].mxu1 }
 0x290   :  { %v1910_v16 = vpop.f32.mrb[35].mxu0  ;;  %v1916_v17 = vpop.f32.mrb[35].mxu1 }
 0x291   :  { %v1460_v15 = vpop.permute.xlu1 %1459 }
 0x292   :  { %2005 = vrcp.f32 %v1460_v15 }
 0x295   :  { %v903_v18 = vpop.f32.mrb[36].mxu0  ;;  %v946_v21 = vpop.f32.mrb[36].mxu1 }
 0x296   :  { %1958 = vmatprep.mubr.msk.f32.mxu0 %vm50_vm1, %v903_v18  ;;  %v1921_v22 = vpop.f32.mrb[37].mxu0  ;;  %v1927_v25 = vpop.f32.mrb[37].mxu1 }
 0x297   :  { %1959 = vmatmul.mubr.msk.f32.gmra.mrb[50].mxu0 %vm50_vm1, %v946_v21  ;;  %v906_v26 = vpop.f32.mrb[38].mxu0  ;;  %v949_v27 = vpop.f32.mrb[38].mxu1 }
 0x298   :  { %v1922_v28 = vpop.f32.mrb[39].mxu0  ;;  %v1928_v29 = vpop.f32.mrb[39].mxu1 }
 0x29d   :  { %v989_v30 = vpop.f32.mrb[40].mxu0  ;;  %v1032_v31 = vpop.f32.mrb[40].mxu1 }
 0x29e   :  { %1961 = vmatprep.mubr.msk.f32.mxu0 %vm50_vm1, %v989_v30  ;;  %v1933_v32 = vpop.f32.mrb[41].mxu0  ;;  %v1939_v33 = vpop.f32.mrb[41].mxu1 }
 0x29f   :  { %1962 = vmatmul.mubr.msk.f32.gmra.mrb[52].mxu0 %vm50_vm1, %v1032_v31  ;;  %v992_v34 = vpop.f32.mrb[42].mxu0  ;;  %v1035_v35 = vpop.f32.mrb[42].mxu1 }
 0x2a0   :  { %v1934_v36 = vpop.f32.mrb[43].mxu0  ;;  %v1940_v37 = vpop.f32.mrb[43].mxu1 }
 0x2a1   :  { %v1465_v37 = vpop.permute.xlu1 %1464 }
 0x2a2   :  { %2007 = vrcp.f32 %v1465_v37 }
 0x2a5   :  { %v1075_v38 = vpop.f32.mrb[44].mxu0  ;;  %v1118_v5 = vpop.f32.mrb[44].mxu1 }
 0x2a6   :  { %1964 = vmatprep.mubr.msk.f32.mxu0 %vm50_vm1, %v1075_v38  ;;  %v1945_v39 = vpop.f32.mrb[45].mxu0  ;;  %v1951_v6 = vpop.f32.mrb[45].mxu1 }
 0x2a7   :  { %1965 = vmatmul.mubr.msk.f32.gmra.mrb[54].mxu0 %vm50_vm1, %v1118_v5  ;;  %v1078_v40 = vpop.f32.mrb[46].mxu0  ;;  %v1121_v41 = vpop.f32.mrb[46].mxu1 }
 0x2a8   :  { %v1946_v42 = vpop.f32.mrb[47].mxu0  ;;  %v1952_v43 = vpop.f32.mrb[47].mxu1 }
 0x2a9   :  { %v2002_v39 = vpop.eup %2001  ;;  %v1380_v40 = vpop.permute.xlu0 %1379 }
 0x2aa   :  { %v2004_v43 = vpop.eup %2003 }
 0x362   :  { %v1957_v56 = vpop.f32.mrb[48].mxu0 }
 0x363   :  { %v1228_v57 = vadd.f32 %v1957_v56, %v2366_v54  ;;  %v1222_v58 = vpop.f32.mrb[49].mxu0 }
 0x364   :  { %v1223_v19 = vadd.f32 %v2366_v54, %v1222_v58 }
 0x365   :  { %v1262_v20 = vmax.f32 %v1228_v57, 0.0 }
 0x366   :  { %v1261_v60 = vmax.f32 %v1223_v19, 0.0 }
 0x367   :  { %v1383_v61 = vmul.f32 %v1350_v51, %v1262_v20  ;;  %v1470_v20 = vpop.permute.xlu0 %1469 }
 0x368   :  { %v1382_v24 = vmul.f32 %v1345_v14, %v1261_v60  ;;  %2009 = vrcp.f32 %v1470_v20 }
 0x369   :  { %v1398_v62 = vsel %vm1390_vm4, %v1383_v61, 0.0 }
 0x36a   :  { %v1399_v63 = vrot.slane %v1398_v62, 4  ;;  %v1391_v0 = vsel %vm1390_vm4, %v1382_v24, 0.0  ;;  %v1960_v1 = vpop.f32.mrb[50].mxu0 }
 0x36b   :  { %v1392_v4 = vrot.slane %v1391_v0, 4  ;;  %v1238_v7 = vadd.f32 %v1960_v1, %v2366_v54  ;;  %v1232_v8 = vpop.f32.mrb[51].mxu0 }
 0x36c   :  { %v1400_v9 = vadd.f32 %v1399_v63, %v1398_v62  ;;  %v1233_v10 = vadd.f32 %v2366_v54, %v1232_v8 }
 0x36d   :  { %v1393_v11 = vadd.f32 %v1392_v4, %v1391_v0  ;;  %v1264_v12 = vmax.f32 %v1238_v7, 0.0  ;;  %v2006_v4 = vpop.eup %2005 }
 0x36e   :  { %v1401_v16 = vrot.slane %v1400_v9, 2  ;;  %v1263_v17 = vmax.f32 %v1233_v10, 0.0 }
 0x36f   :  { %v1394_v18 = vrot.slane %v1393_v11, 2  ;;  %v1385_v21 = vmul.f32 %v1360_v52, %v1264_v12 }
 0x370   :  { %v1402_v22 = vadd.f32 %v1401_v16, %v1400_v9  ;;  %v1384_v25 = vmul.f32 %v1355_v50, %v1263_v17  ;;  %v2008_v9 = vpop.eup %2007 }
 0x371   :  { %v1395_v26 = vadd.f32 %v1394_v18, %v1393_v11  ;;  %v1412_v27 = vsel %vm1390_vm4, %v1385_v21, 0.0  ;;  %v1480_v21 = vpop.permute.xlu0 %1479 }
 0x372   :  { %v1403_v28 = vrot.slane %v1402_v22, 1  ;;  %v1413_v29 = vrot.slane %v1412_v27, 4  ;;  %v1405_v30 = vsel %vm1390_vm4, %v1384_v25, 0.0  ;;  %v1963_v31 = vpop.f32.mrb[52].mxu0 }
 0x373   :  { %v1396_v32 = vrot.slane %v1395_v26, 1  ;;  %v1406_v33 = vrot.slane %v1405_v30, 4  ;;  %v1248_v34 = vadd.f32 %v1963_v31, %v2366_v54  ;;  %v1242_v35 = vpop.f32.mrb[53].mxu0 }
 0x374   :  { %v1404_v36 = vadd.f32 %v1403_v28, %v1402_v22  ;;  %v1414_v38 = vadd.f32 %v1413_v29, %v1412_v27  ;;  %v1243_v5 = vadd.f32 %v2366_v54, %v1242_v35 }
 0x375   :  { %v1397_v6 = vadd.f32 %v1396_v32, %v1395_v26  ;;  %v1407_v41 = vadd.f32 %v1406_v33, %v1405_v30  ;;  %v1266_v42 = vmax.f32 %v1248_v34, 0.0 }
 0x376   :  { %v1490_v44 = vmul.f32 %v2002_v39, %v1404_v36  ;;  %v1415_v45 = vrot.slane %v1414_v38, 2  ;;  %v1265_v46 = vmax.f32 %v1243_v5, 0.0 }
 0x377   :  { %v1488_v47 = vmul.f32 %v2004_v43, %v1397_v6  ;;  %v1408_v48 = vrot.slane %v1407_v41, 2  ;;  %v1387_v13 = vmul.f32 %v1370_v55, %v1266_v42  ;;  %v1475_v55 = vpop.permute.xlu1 %1474 }
 0x378   :  { %v1416_v49 = vadd.f32 %v1415_v45, %v1414_v38  ;;  %v1386_v14 = vmul.f32 %v2361_v53, %v1265_v46  ;;  %2011 = vrcp.f32 %v1475_v55 }
 0x379   :  { %v1523_v50 = vsel %vm1522_vm5, %v1490_v44, %v1488_v47  ;;  %v1409_v51 = vadd.f32 %v1408_v48, %v1407_v41  ;;  %v1426_v52 = vsel %vm1390_vm4, %v1387_v13, 0.0  ;;  %2013 = vrcp.f32 %v1480_v21 }
 0x37a   :  { %v1417_v56 = vrot.slane %v1416_v49, 1  ;;  %v1427_v57 = vrot.slane %v1426_v52, 4  ;;  %v1419_v58 = vsel %vm1390_vm4, %v1386_v14, 0.0  ;;  %v1966_v19 = vpop.f32.mrb[54].mxu0 }
 0x37b   :  { %v1410_v60 = vrot.slane %v1409_v51, 1  ;;  %v1420_v61 = vrot.slane %v1419_v58, 4  ;;  %v1258_v23 = vadd.f32 %v1966_v19, %v2366_v54  ;;  %v1252_v24 = vpop.f32.mrb[55].mxu0  ;;  %v1485_v25 = vpop.permute.xlu1 %1484 }
 0x37c   :  { %v1418_v62 = vadd.f32 %v1417_v56, %v1416_v49  ;;  %v1428_v63 = vadd.f32 %v1427_v57, %v1426_v52  ;;  %v1253_v53 = vadd.f32 %v2366_v54, %v1252_v24  ;;  %2015 = vrcp.f32 %v1485_v25  ;;  %v1610_v52 = vld [vmem:[%s2422_s7 + $0x8] sm:$0xff]  ;;  %v1740_v57 = vld [vmem:[%s2421_s6] ss:$0 sm:$0xff] }
 0x37d   :  { %v1411_v0 = vadd.f32 %v1410_v60, %v1409_v51  ;;  %v1421_v1 = vadd.f32 %v1420_v61, %v1419_v58  ;;  %v1268_v3 = vmax.f32 %v1258_v23, 0.0  ;;  %v1609_v51 = vld [vmem:[%s2422_s7] sm:$0xff]  ;;  %s2017_s7 = scalar_lea.vmem %s1700_s27, 128 }
 0x37e   :  { %v1429_v7 = vrot.slane %v1428_v63, 2  ;;  %v1267_v8 = vmax.f32 %v1253_v53, 0.0  ;;  %v1494_v15 = vmul.f32 %v2008_v9, %v1418_v62  ;;  %v1992_v56 = vpack.c.bf16 %v1610_v52, %v1609_v51  ;;  %p2018_p0 = scmp.ne.s32.totalorder %s1700_s27, %s2017_s7  ;;  %p2023_p2 = scmp.lt.s32.totalorder %s2017_s7, %s2017_s7 }
 0x37f   :  { %v1492_v10 = vmul.f32 %v2006_v4, %v1411_v0  ;;  %v1422_v11 = vrot.slane %v1421_v1, 2  ;;  %v1389_v12 = vmul.f32 %v1380_v40, %v1268_v3 }
 0x380   :  { %v1430_v16 = vadd.f32 %v1429_v7, %v1428_v63  ;;  %v1388_v17 = vmul.f32 %v2370_v59, %v1267_v8  ;;  %v2010_v59 = vpop.eup %2009  ;;  %p2024_p3 = por %p2023_p2, %p2022_p1 }
 0x381   :  { %v1525_v18 = vsel %vm1524_vm6, %v1492_v10, %v1523_v50  ;;  %v1423_v54 = vadd.f32 %v1422_v11, %v1421_v1  ;;  %v1440_v22 = vsel %vm1390_vm4, %v1389_v12, 0.0 }
 0x382   :  { %v1431_v26 = vrot.slane %v1430_v16, 1  ;;  %v1441_v27 = vrot.slane %v1440_v22, 4  ;;  %v1433_v28 = vsel %vm1390_vm4, %v1388_v17, 0.0  ;;  %v1527_v29 = vsel %vm1526_vm7, %v1494_v15, %v1525_v18  ;;  %v2012_v37 = vpop.eup %2011  ;;  %p2025_p4 = pnand %p2024_p3, %p2018_p0 }
 0x383   :  { %v1424_v30 = vrot.slane %v1423_v54, 1  ;;  %v1434_v31 = vrot.slane %v1433_v28, 4  ;;  %v2014_v47 = vpop.eup %2013 }
 0x384   :  { %v1432_v32 = vadd.f32 %v1431_v26, %v1430_v16  ;;  %v1442_v33 = vadd.f32 %v1441_v27, %v1440_v22 }
 0x385   :  { %v1425_v34 = vadd.f32 %v1424_v30, %v1423_v54  ;;  %v1435_v35 = vadd.f32 %v1434_v31, %v1433_v28 }
 0x386   :  { %v1443_v36 = vrot.slane %v1442_v33, 2  ;;  %v1498_v39 = vmul.f32 %v2012_v37, %v1432_v32  ;;  %v2016_v48 = vpop.eup %2015 }
 0x387   :  { %v1496_v38 = vmul.f32 %v2010_v59, %v1425_v34  ;;  %v1436_v5 = vrot.slane %v1435_v35, 2 }
 0x388   :  { %v1444_v6 = vadd.f32 %v1443_v36, %v1442_v33 }
 0x389   :  { %v1437_v40 = vadd.f32 %v1436_v5, %v1435_v35  ;;  %v1529_v41 = vsel %vm1528_vm8, %v1496_v38, %v1527_v29 }
 0x38a   :  { %v1445_v42 = vrot.slane %v1444_v6, 1  ;;  %v1531_v43 = vsel %vm1530_vm9, %v1498_v39, %v1529_v41 }
 0x38b   :  { %v1438_v44 = vrot.slane %v1437_v40, 1 }
 0x38c   :  { %v1446_v45 = vadd.f32 %v1445_v42, %v1444_v6 }
 0x38d   :  { %v1439_v46 = vadd.f32 %v1438_v44, %v1437_v40 }
 0x38e   :  { %v1502_v49 = vmul.f32 %v2016_v48, %v1446_v45 }
 0x38f   :  { %v1500_v13 = vmul.f32 %v2014_v47, %v1439_v46 }
 0x391   :  { %v1533_v14 = vsel %vm1532_vm10, %v1500_v13, %v1531_v43 }
 0x392   :  { %v1535_v50 = vsel %vm1534_vm11, %v1502_v49, %v1533_v14 }
 0x393   :  { %1976 = vmatmul.mubr.msk.f32.vlgmr.msra.gmra.mrb[48].mxu1 %vm1390_vm4, %v1535_v50 }
 0x394   :  { %1982 = vmatprep.mubr.msk.f32.mxu1 %vm2042_vm2, %v2041_v2  ;;  %1993 = vmatpush3.bf16.msra.mxu1 %v1992_v56  ;;  %v1742_v2 = vld [vmem:[%s2423_s8] ss:$0 sm:$0xff] }
 0x466   :  { %v1604_v58 = vpop.f32.mrb[48].mxu1 }
 0x467   :  { %v1605_v19 = vadd.f32 %v1740_v57, %v1604_v58  ;;  %v1977_v20 = vpop.f32.mrb[49].mxu1 }
 0x469   :  { %v1608_v60 = vmax.f32 %v1605_v19, 0.0 }
 0x46b   :  { %1983 = vmatmul.mubr.msk.f32.vlgmr.msra.gmra.mrb[50].mxu1 %vm1618_vm12, %v1608_v60 }
 0x53e   :  { %v1688_v61 = vpop.f32.mrb[50].mxu1 }
 0x53f   :  { %v1689_v23 = vadd.f32 %v1742_v2, %v1688_v61  ;;  %v1984_v24 = vpop.f32.mrb[51].mxu1 }
 0x541   :  { %1692 = vst [vmem:[#allocation2] sm:$0xff] %v1689_v23 }
 0x542   :  { %2028 = shalt.err (!%p2025_p4)
}
 0x543   :  { %s2029_s29 = scalar_lea.hbm %s2424_s9, 128 }
 0x544   :  { %p2030_p5 = scmp.ne.s32.totalorder %s2424_s9, %s2029_s29  ;;  %p2033_p6 = scmp.lt.u32.totalorder %s2029_s29, %s2424_s9 }
 0x546   :  { %p2035_p7 = pnand %p2033_p6, %p2030_p5 }
 0x548   :  { %2038 = shalt.err (!%p2035_p7)
}
 0x549   :  { %1702 = dma.vmem_to_hbm [thread:$0]  %s1700_s27, 128, %s2424_s9, [#allocation3]  }
 0x54a   :  { %2039 = dma.done.wait [#allocation3], 128  }
 0x54b   :  { %2040 = vsyncadd [#allocation3], 4294967168 }
 0x54c   :  { %1706 = vsyncpa [#allocation3], 1 }

</bundles_post_ra>
